<compile_context>
chip_gen: v7x
topology: tpu7x:2x2x1
jax: 0.10.0
libtpu: 0.0.40
codegen_flags: <defaults>
</compile_context>

<pallas_src>
import jax
import jax.numpy as jnp
from jax.experimental import pallas as pl
from jax.experimental.pallas import tpu as pltpu


def _round_up(v, m):
    return (v + m - 1) // m * m


def _make_kernel(num_classes):
    def kernel(x_ref,        # (block_b, D) f32  VMEM (auto-pipelined batch tile)
               lab_ref,      # (block_b, 1) i32  VMEM (auto-pipelined label tile)
               centers_ref,  # (C, D)       f32  VMEM (resident: constant index_map)
               out_ref):     # (block_b, 1) f32  VMEM (per-row partial contributions)
        x = x_ref[...]
        lab = lab_ref[...]
        centers = centers_ref[...]

        # classes = [-9999, 1, 2, ..., C-1], exactly as in the PyTorch module.
        cls = jax.lax.broadcasted_iota(jnp.int32, (x.shape[0], num_classes), 1)
        cls = jnp.where(cls == 0, -9999, cls)

        # One-hot match mask (each label matches at most one class).
        h = (lab == cls).astype(jnp.float32)                 # (block_b, C)

        # Gather the matched center per row on the otherwise-idle MXU.
        c_g = jnp.dot(h, centers, preferred_element_type=jnp.float32)  # (block_b, D)

        # d_i = ||x_i||^2 + ||c_{l_i}||^2 - 2 x_i . c_{l_i}; one lane reduce/row.
        d = jnp.sum(x * x + c_g * c_g - 2.0 * (x * c_g), axis=1, keepdims=True)

        # Rows whose label matches some class (label 0 == padded rows never do).
        matched = (lab == -9999) | ((lab >= 1) & (lab < num_classes))  # (block_b, 1)

        out_ref[...] = jnp.where(matched, jnp.clip(d, 1e-12, 1e12), 0.0)

    return kernel


def center_loss(x, centers, labels, *, block_b=None):
    """CenterLoss forward.  x: (B, D), centers: (C, D), labels: (B,) int."""
    B, D = x.shape
    C, Dc = centers.shape
    assert D == Dc

    if block_b is None:
        block_b = min(1024, _round_up(B, 8))
    block_b = max(8, _round_up(block_b, 8))
    b_pad = _round_up(B, block_b)
    n_tiles = b_pad // block_b

    x = x.astype(jnp.float32)
    centers = centers.astype(jnp.float32)
    labels = labels.astype(jnp.int32)

    # Analytic clamp floor: every masked-out (i, j) entry contributes exactly
    # 1e-12 to the PyTorch sum.  Each row matches at most one class.
    matched_rows = (labels == -9999) | ((labels >= 1) & (labels < C))
    floor = (jnp.float32(B * C)
             - jnp.sum(matched_rows.astype(jnp.float32))) * jnp.float32(1e-12)

    if b_pad != B:
        x = jnp.pad(x, ((0, b_pad - B), (0, 0)))
        labels = jnp.pad(labels, (0, b_pad - B))   # label 0 -> never matched
    labels_col = labels.reshape(b_pad, 1)

    kernel = _make_kernel(C)

    # VMEM guard: only needed when the resident centers table / tiles get big
    # (v5e's default scoped VMEM is ~16 MiB; cap well under v7x's 64 MiB).
    params = {"dimension_semantics": ("parallel",)}
    est_bytes = 4 * (2 * block_b * (D + 2) + 2 * C * D)
    if est_bytes > 12 * 1024 * 1024:
        params["vmem_limit_bytes"] = int(min(2 * est_bytes, 56 * 1024 * 1024))

    partials = pl.pallas_call(
        kernel,
        out_shape=jax.ShapeDtypeStruct((b_pad, 1), jnp.float32),
        grid=(n_tiles,),
        in_specs=[
            pl.BlockSpec((block_b, D), lambda i: (i, 0)),   # x batch tile
            pl.BlockSpec((block_b, 1), lambda i: (i, 0)),   # label column tile
            pl.BlockSpec((C, D), lambda i: (0, 0)),         # centers, VMEM-resident
        ],
        out_specs=pl.BlockSpec((block_b, 1), lambda i: (i, 0)),
        compiler_params=pltpu.CompilerParams(**params),
    )(x, labels_col, centers)

    return jnp.sum(partials) + floor


def center_loss_ref(x, centers, labels):
    """Pure-JAX reference mirroring the PyTorch forward, for verification."""
    C = centers.shape[0]
    x2 = jnp.sum(x * x, axis=1, keepdims=True)
    c2 = jnp.sum(centers * centers, axis=1)[None, :]
    distmat = x2 + c2 - 2.0 * (x @ centers.T)
    classes = jnp.concatenate(
        [jnp.array([-9999], jnp.int32), jnp.arange(1, C, dtype=jnp.int32)]
    )
    mask = (labels[:, None].astype(jnp.int32) == classes[None, :]).astype(jnp.float32)
    dist = distmat * mask
    return jnp.sum(jnp.clip(dist, 1e-12, 1e12))


if __name__ == "__main__":
    num_classes = 16
    feat_dim = 32
    batch = 30  # deliberately not a multiple of the batch tile to exercise padding

    key = jax.random.PRNGKey(0)
    k_centers, k_x, k_labels = jax.random.split(key, 3)

    # Deterministic "parameter" init mirroring torch.randn(num_classes, feat_dim).
    centers = jax.random.normal(k_centers, (num_classes, feat_dim), dtype=jnp.float32)
    x = jax.random.normal(k_x, (batch, feat_dim), dtype=jnp.float32)
    labels = jax.random.randint(k_labels, (batch,), 0, num_classes, dtype=jnp.int32)

    # Small block_b so the test exercises a multi-step grid, padding, the
    # one-hot MXU gather, and the wrapper-side reduction.
    loss = center_loss(x, centers, labels, block_b=8)
    jax.block_until_ready(loss)

    ref = center_loss_ref(x, centers, labels)
    assert jnp.allclose(loss, ref, rtol=1e-5, atol=1e-5), (loss, ref)

    print("KERNEL_OK")
</pallas_src>

<mosaic_0001>
module attributes {stable_mosaic.version = 11 : i64} {
  func.func @kernel(%arg0: i32, %arg1: memref<8x32xf32, #tpu.memory_space<vmem>>, %arg2: memref<8x1xi32, #tpu.memory_space<vmem>>, %arg3: memref<16x32xf32, #tpu.memory_space<vmem>>, %arg4: memref<8x1xf32, #tpu.memory_space<vmem>>) attributes {dimension_semantics = [#tpu.dimension_semantics<parallel>], iteration_bounds = array<i64: 4>, scalar_prefetch = 0 : i64, scratch_operands = 0 : i64, tpu.core_type = #tpu.core_type<tc>, window_params = [{transform_indices = @transform_0, window_bounds = array<i64: 8, 32>}, {transform_indices = @transform_1, window_bounds = array<i64: 8, 1>}, {pipeline_mode = #tpu.pipeline_mode<synchronous>, transform_indices = @transform_2, window_bounds = array<i64: 16, 32>}, {transform_indices = @transform_3, window_bounds = array<i64: 8, 1>}]} {
    %c0 = arith.constant 0 : index
    %c0_0 = arith.constant 0 : index
    %0 = vector.load %arg1[%c0, %c0_0] : memref<8x32xf32, #tpu.memory_space<vmem>>, vector<8x32xf32>
    %c0_1 = arith.constant 0 : index
    %c0_2 = arith.constant 0 : index
    %1 = vector.load %arg2[%c0_1, %c0_2] : memref<8x1xi32, #tpu.memory_space<vmem>>, vector<8x1xi32>
    %c0_3 = arith.constant 0 : index
    %c0_4 = arith.constant 0 : index
    %2 = vector.load %arg3[%c0_3, %c0_4] : memref<16x32xf32, #tpu.memory_space<vmem>>, vector<16x32xf32>
    %3 = tpu.iota {dimensions = array<i32: 1>} : vector<8x16xi32>
    %c0_i32 = arith.constant 0 : i32
    %4 = vector.broadcast %c0_i32 : i32 to vector<8x16xi32>
    %5 = arith.cmpi eq, %3, %4 : vector<8x16xi32>
    %c-9999_i32 = arith.constant -9999 : i32
    %6 = vector.broadcast %c-9999_i32 : i32 to vector<8x16xi32>
    %7 = arith.select %5, %6, %3 : vector<8x16xi1>, vector<8x16xi32>
    %8 = vector.broadcast %1 : vector<8x1xi32> to vector<8x16xi32>
    %9 = arith.cmpi eq, %8, %7 : vector<8x16xi32>
    %10 = arith.extui %9 : vector<8x16xi1> to vector<8x16xi32>
    %11 = arith.sitofp %10 : vector<8x16xi32> to vector<8x16xf32>
    %cst = arith.constant dense<0.000000e+00> : vector<8x32xf32>
    %12 = tpu.matmul %11, %2, %cst {dimension_numbers = #tpu.dot_dimension_numbers<[1], [0], [0], [1], [0, 0, 1, 1], [], []>} : vector<8x16xf32>, vector<16x32xf32>, vector<8x32xf32> -> vector<8x32xf32>
    %13 = arith.mulf %0, %0 : vector<8x32xf32>
    %14 = arith.mulf %12, %12 : vector<8x32xf32>
    %15 = arith.addf %13, %14 : vector<8x32xf32>
    %16 = arith.mulf %0, %12 : vector<8x32xf32>
    %cst_5 = arith.constant 2.000000e+00 : f32
    %17 = vector.broadcast %cst_5 : f32 to vector<8x32xf32>
    %18 = arith.mulf %17, %16 : vector<8x32xf32>
    %19 = arith.subf %15, %18 : vector<8x32xf32>
    %cst_6 = arith.constant dense<0.000000e+00> : vector<8xf32>
    %20 = vector.multi_reduction <add>, %19, %cst_6 [1] : vector<8x32xf32> to vector<8xf32>
    %21 = vector.shape_cast %20 : vector<8xf32> to vector<8x1xf32>
    %c-9999_i32_7 = arith.constant -9999 : i32
    %22 = vector.broadcast %c-9999_i32_7 : i32 to vector<8x1xi32>
    %23 = arith.cmpi eq, %1, %22 : vector<8x1xi32>
    %c1_i32 = arith.constant 1 : i32
    %24 = vector.broadcast %c1_i32 : i32 to vector<8x1xi32>
    %25 = arith.cmpi sge, %1, %24 : vector<8x1xi32>
    %c16_i32 = arith.constant 16 : i32
    %26 = vector.broadcast %c16_i32 : i32 to vector<8x1xi32>
    %27 = arith.cmpi slt, %1, %26 : vector<8x1xi32>
    %28 = arith.andi %25, %27 : vector<8x1xi1>
    %29 = arith.ori %23, %28 : vector<8x1xi1>
    %cst_8 = arith.constant 9.99999996E-13 : f32
    %cst_9 = arith.constant 9.99999995E+11 : f32
    %30 = vector.broadcast %cst_8 : f32 to vector<8x1xf32>
    %31 = arith.maximumf %30, %21 : vector<8x1xf32>
    %32 = vector.broadcast %cst_9 : f32 to vector<8x1xf32>
    %33 = arith.minimumf %32, %31 : vector<8x1xf32>
    %cst_10 = arith.constant 0.000000e+00 : f32
    %34 = vector.broadcast %cst_10 : f32 to vector<8x1xf32>
    %35 = arith.select %29, %33, %34 : vector<8x1xi1>, vector<8x1xf32>
    %c0_11 = arith.constant 0 : index
    %c0_12 = arith.constant 0 : index
    %36 = vector.load %arg4[%c0_11, %c0_12] : memref<8x1xf32, #tpu.memory_space<vmem>>, vector<8x1xf32>
    tpu.vector_store %arg4[%c0_11, %c0_12], %35 {strides = array<i32>} : memref<8x1xf32, #tpu.memory_space<vmem>>, vector<8x1xf32>,
    return
  }
  func.func @transform_0(%arg0: i32) -> (i32, i32) {
    %c0_i32 = arith.constant 0 : i32
    %c0_i32_0 = arith.constant 0 : i32
    return %arg0, %c0_i32 : i32, i32
  }
  func.func @transform_1(%arg0: i32) -> (i32, i32) {
    %c0_i32 = arith.constant 0 : i32
    %c0_i32_0 = arith.constant 0 : i32
    return %arg0, %c0_i32 : i32, i32
  }
  func.func @transform_2(%arg0: i32) -> (i32, i32) {
    %c0_i32 = arith.constant 0 : i32
    %c0_i32_0 = arith.constant 0 : i32
    %c0_i32_1 = arith.constant 0 : i32
    return %c0_i32, %c0_i32_0 : i32, i32
  }
  func.func @transform_3(%arg0: i32) -> (i32, i32) {
    %c0_i32 = arith.constant 0 : i32
    %c0_i32_0 = arith.constant 0 : i32
    return %arg0, %c0_i32 : i32, i32
  }
}

</mosaic_0001>

<bundles_post_ra>
// kernel: tpu_custom_call.1
= control target key start
LH: loop header
LB: loop body
LE: loop exit
PB: predicated region body
PF: predicated region fallthrough
CT: control target
= control target key end

     0   :  { %8 = vsyncpa [#allocation3], 0  ;;  %s503_s12 = smov 0   ;;  %s567_s0 = inlined_call_operand.vmem [shape: f32[32,32], index: 0, kind: input, shape index: {}]   ;;  %s568_s1 = inlined_call_operand.vmem [shape: s32[32,1], index: 1, kind: input, shape index: {}]   ;;  %s569_s2 = inlined_call_operand.hbm [shape: f32[16,32], index: 2, kind: input, shape index: {}]   ;;  %s570_s3 = inlined_call_operand.vmem [shape: f32[32,1], index: 3, kind: output, shape index: {}]  }
   0x1 LB: > { %s509_s13 = sadd.s32 4294967295, %s474_s12   ;;  %p385_p0 = scmp.ge.s32.totalorder %s474_s12, 1  ;;  %s474_s12 = sphi %s503_s12, %s14_s12  }
   0x2   : > { %p118_p1 = scmp.lt.s32.totalorder %s474_s12, 5  ;;  %s476_s14 = smov [#allocation2]  }
   0x3   : > { %s130_s15 = sshll.u32 %s476_s14, 4  ;;  %p571_p3 = scmp.eq.s32.totalorder %s509_s13, 0  ;;  %s131_s15 = int_to_ptr.vmem [resolvable:$true] %s130_s15 }
   0x4   : > { %p513_p2 = pnand %p385_p0, %p118_p1  ;;  %s436_s20 = scalar_lea.hbm %s569_s2, 256 }
   0x5   : > { %p437_p6 = scmp.ne.s32.totalorder %s569_s2, %s436_s20  ;;  %p443_p10 = scmp.lt.u32.totalorder %s436_s20, %s569_s2 }
   0x6   : > { %s573_s16 = scalar_select %p513_p2, 1, 0 }
   0x7   : > { %p414_p4 = pneg %p513_p2 }
   0x9   : > { %p522_p5 = pnand %p571_p3, %p414_p4 }
   0xb   : > { %p438_p7 = pneg %p522_p5 }
   0xd   : > { %p439_p8 = pnand %p438_p7, %p437_p6 }
   0xf   : > { %p440_p9 = pneg %p439_p8 }
  0x11   : > { %p445_p11 = pnand %p443_p10, %p440_p9 }
  0x13   : > { %448 = shalt.err (!%p445_p11)
}
  0x14   : > { %s449_s25 = scalar_lea.vmem %s131_s15, 256  ;;  %p457_p1 = scmp.lt.s32.totalorder %s131_s15, %s131_s15 }
  0x15   : > { %p450_p12 = scmp.ne.s32.totalorder %s131_s15, %s449_s25  ;;  %p458_p4 = scmp.lt.s32.totalorder %s449_s25, %s449_s25 }
  0x17   : > { %p452_p13 = pnand %p450_p12, %p438_p7  ;;  %p459_p3 = por %p458_p4, %p457_p1 }
  0x19   : > { %p453_p0 = pneg %p452_p13 }
  0x1b   : > { %p460_p2 = pnand %p459_p3, %p453_p0 }
  0x1d   : > { %463 = shalt.err (!%p460_p2)
}
  0x1e   : > { %s477_s26 = smov 128   ;;  %s478_s27 = smov 8  }
  0x1f   : > { %417 = dma.hbm_to_vmem [thread:$0]  (!%p522_p5), %s569_s2, 256, %s131_s15, [#allocation3], %s477_s26, %s477_s26, %s478_s27  }
  0x20   : > { %p575_p6 = scmp.ne.s32.totalorder %s573_s16, 0 }
  0x21   : > { %p576_p8 = scmp.eq.s32.totalorder (!%p575_p6), %s509_s13, 0 }
  0x22   : > { %160 = sbr.rel (%p575_p6) target bundleno = 545 (0x221), region = 32 }
  0x29   : > { %469 = dma.done.wait (%p576_p8), [#allocation3], 256   ;;  %p577_p7 = pmov %p576_p8 }
  0x2a   : > { %p186_p2 = scmp.lt.s32.totalorder %s509_s13, 3  ;;  %v479_v0 = vmov 0   ;;  %v480_v1 = vmov 0.0|0.0   ;;  %v200_v3 = vld [vmem:[#allocation2] sm:$0xff]  ;;  %v201_v4 = vld [vmem:[#allocation2 + $0x8] sm:$0xff]  ;;  %vm481_vm0 = vmmov 0   ;;  %v202_v7 = vlaneseq }
  0x2b   : > { %471 = vsyncadd (%p577_p7), [#allocation3], 4294967040  ;;  %435 = vset.pattern.permute.xlu0 %v479_v0  ;;  %407 = vmatprep.subr.bf16.mxu0 %v480_v1  ;;  %v408_v5 = vpack.c.bf16 %v201_v4, %v200_v3  ;;  %v482_v6 = vmov 0.0   ;;  %vm212_vm2 = vcmask 130048   ;;  %vm292_vm4 = vcmask 261120  }
  0x2c   : > { %s579_s13 = smov (!%p186_p2, %s509_s13), 3  ;;  %404 = vmatprep.mubr.msk.f32.mxu0 %vm481_vm0, %v482_v6  ;;  %v203_v8 = vand.u32 127, %v202_v7  ;;  %vm304_vm10 = vcmask 7168  }
  0x2d   : > { %s550_s30 = sshll.u32 %s579_s13, 3  ;;  %409 = vmatpush3.bf16.msra.mxu0 %v408_v5 }
  0x2e   : > { %s193_s6 = scalar_lea.vmem %s568_s1, %s550_s30  ;;  %vm204_vm1 = vcmp.eq.s32.totalorder %v203_v8, 0  ;;  %s189_s9 = scalar_lea.vmem %s567_s0, %s550_s30 }
  0x2f   : > { %v199_v2 = vld [vmem:[%s193_s6] sm:$0xff]  ;;  %v205_v9 = vsel %vm204_vm1, 4294957297, %v203_v8  ;;  %s197_s13 = scalar_lea.vmem %s570_s3, %s550_s30 }
  0x30   : > { %207 = vperm.xlu0 %435, %v199_v2   ;;  %v198_v12 = vld [vmem:[%s189_s9] sm:$0xff]  ;;  %vm297_vm5 = vcmp.ge.s32.totalorder %v199_v2, 1  ;;  %vm298_vm6 = vcmp.lt.s32.totalorder %v199_v2, 16  ;;  %vm296_vm7 = vcmp.eq.s32.totalorder %v199_v2, 4294957297 }
  0x31   : > { %v286_v13 = vmul.f32 %v198_v12, %v198_v12  ;;  %vm299_vm8 = vmand %vm297_vm5, %vm298_vm6 }
  0x32   : > { %vm300_vm9 = vmor %vm296_vm7, %vm299_vm8 }
  0xaf   : > { %v208_v10 = vpop.permute.xlu0 %207 }
  0xb0   : > { %vm209_vm3 = vcmp.eq.s32.totalorder %v208_v10, %v205_v9 }
  0xb1   : > { %v393_v11 = vsel %vm209_vm3, 1.0, %v482_v6 }
  0xb2   : > { %405 = vmatmul.mubr.msk.f32.vlgmr.msra.gmra.mrb[0].mxu0 %vm212_vm2, %v393_v11 }
 0x185   : > { %v282_v14 = vpop.f32.mrb[0].mxu0 }
 0x186   : > { %v287_v15 = vmul.f32 %v282_v14, %v282_v14  ;;  %v289_v16 = vmul.f32 %v282_v14, %v198_v12  ;;  %v406_v17 = vpop.f32.mrb[1].mxu0 }
 0x188   : > { %v288_v18 = vadd.f32 %v287_v15, %v286_v13  ;;  %v290_v19 = vmul.f32 2.0, %v289_v16 }
 0x18a   : > { %v291_v20 = vsub.f32 %v288_v18, %v290_v19 }
 0x18c   : > { %v293_v21 = vsel %vm292_vm4, %v291_v20, 0.0 }
 0x18d   : > { %294 = vadd.xlane.f32.xlu0 %v293_v21 }
 0x21a   : > { %v295_v22 = vpop.xlane.xlu0 %294 }
 0x21b   : > { %v301_v23 = vmax.f32 %v295_v22, 1e-12 }
 0x21d   : > { %v302_v24 = vmin.f32 %v301_v23, 1e+12 }
 0x21f   : > { %v303_v25 = vsel %vm300_vm9, %v302_v24, 0.0 }
 0x220   : > { %305 = vst.msk [vmem:[%s197_s13] sm:$0xff] %vm304_vm10, %v303_v25 }
 0x221 PF: > { %s14_s12 = sadd.s32 1, %s474_s12  }
 0x222   : > { %p11_p3 = scmp.ge.s32.totalorder %s14_s12, 6  }
 0x224   :  { %13 = sbr.rel (!%p11_p3) target bundleno = 1 (0x1), region = 70 }
 0x22b   :  { %325 = vsyncpa [#allocation3], 1 }
 0x22c   :  { %327 = vsyncpa [#allocation3 + $0x1], 1 }

</bundles_post_ra>
